<compile_context>
chip_gen: v7x
topology: tpu7x:2x2x1
jax: 0.10.0
libtpu: 0.0.40
codegen_flags: <defaults>
</compile_context>

<pallas_src>
import jax
import jax.numpy as jnp
from jax import lax
from jax.experimental import pallas as pl
from jax.experimental.pallas import tpu as pltpu

STATE_DIM = 3
ACTION_DIM = 1
HIDDEN_DIM = 64

_MAX_BATCH_TILE = 4096   # per-step VMEM footprint stays well under 1 MiB even here


def qvaluenet_kernel(x_ref, a_ref, w1x_ref, w1a_ref, b1_ref, w2_ref, b2_ref,
                     w3_ref, b3_ref, o_ref):
    """Whole 3-layer MLP for one batch tile; activations kept as [feat, batch]."""
    f32 = jnp.float32
    cdt = w2_ref.dtype                       # compute dtype of the matmul stream
    mm = (((1,), (0,)), ((), ()))            # [out, in] @ [in, tb]

    # fc1 with fused concat: W1x[64,3] @ x[3,tb] + W1a[64,1] @ a[1,tb].
    # x/a arrive f32 from HBM and are cast here (idle VALU slots); no-op for f32.
    x_t = x_ref[...].astype(cdt)
    a_t = a_ref[...].astype(cdt)
    h1 = lax.dot_general(w1x_ref[...], x_t, mm, preferred_element_type=f32)
    h1 = h1 + lax.dot_general(w1a_ref[...], a_t, mm, preferred_element_type=f32)
    h1 = jnp.maximum(h1 + b1_ref[...], 0.0).astype(cdt)          # relu(fc1), [64, tb]

    # fc2 / fc_out: plain [out, in] @ [in, tb] matmuls, f32 accumulation.
    h2 = lax.dot_general(w2_ref[...], h1, mm, preferred_element_type=f32)
    h2 = jnp.maximum(h2 + b2_ref[...], 0.0).astype(cdt)          # relu(fc2), [64, tb]

    q = lax.dot_general(w3_ref[...], h2, mm, preferred_element_type=f32)
    o_ref[...] = (q + b3_ref[...]).astype(o_ref.dtype)           # fc_out, [1, tb]


def _num_tensorcores_per_chip():
    """Best-effort TC count: v7x has 2 TensorCores/chip, earlier gens have 1."""
    try:
        kind = jax.devices()[0].device_kind.lower()
        if "v7" in kind or "7x" in kind:
            return 2
    except Exception:
        pass
    return 1


def _choose_batch_tile(batch, num_cores):
    """Per-grid-step overhead dominates this kernel, not VMEM or HBM bandwidth."""
    padded = 128 * pl.cdiv(batch, 128)
    if num_cores <= 1:
        # Single TensorCore (v5e/v6e): one grid step covering the whole batch.
        return min(padded, _MAX_BATCH_TILE)
    # Multi-TC (v7x): aim for exactly `num_cores` parallel grid steps.
    tile = 128 * pl.cdiv(pl.cdiv(batch, num_cores), 128)
    return max(128, min(tile, _MAX_BATCH_TILE))


def prepare_params(params, state_dim=STATE_DIM, *, compute_dtype=jnp.float32):
    """One-time preprocessing, hoisted out of the per-call forward path.

    Splits fc1's weight to fuse torch.cat([x, a]) and casts weights to the
    compute dtype. Biases stay f32 (bias-add / ReLU run on the VPU in f32).
    On v5e keep compute_dtype=float32 (no bf16 VPU)."""
    w1, b1, w2, b2, w3, b3 = params
    cdt = compute_dtype
    return (jnp.asarray(w1[:, :state_dim], cdt),     # W1x [hidden, state_dim]
            jnp.asarray(w1[:, state_dim:], cdt),     # W1a [hidden, action_dim]
            jnp.asarray(b1, jnp.float32),            # b1  [hidden, 1]
            jnp.asarray(w2, cdt),                    # W2  [hidden, hidden]
            jnp.asarray(b2, jnp.float32),            # b2  [hidden, 1]
            jnp.asarray(w3, cdt),                    # W3  [1, hidden]
            jnp.asarray(b3, jnp.float32))            # b3  [1, 1]


def qvaluenet_forward(x, a, prepared, *, batch_tile=None):
    """x: [B, state_dim], a: [B, action_dim] -> q: [B, 1] (float32).

    `prepared` comes from prepare_params(); all weight slicing/casting is done
    there once, not per call."""
    w1x, w1a, b1, w2, b2, w3, b3 = prepared
    B, state_dim = x.shape
    _, action_dim = a.shape
    hidden = w2.shape[0]

    if batch_tile is None:
        batch_tile = _choose_batch_tile(B, _num_tensorcores_per_chip())
    grid_len = pl.cdiv(B, batch_tile)

    # Feature-major layout: batch rides the 128-lane axis of every tile, so the
    # x/a DMAs are contiguous rows and the MXU RHS needs no relayout.
    x_t = x.T        # [state_dim, B]
    a_t = a.T        # [action_dim, B]

    full = lambda i: (0, 0)      # weights/biases: same (resident) block every step

    out_t = pl.pallas_call(
        qvaluenet_kernel,
        out_shape=jax.ShapeDtypeStruct((1, B), jnp.float32),
        grid_spec=pltpu.PrefetchScalarGridSpec(
            num_scalar_prefetch=0,
            grid=(grid_len,),
            in_specs=[
                pl.BlockSpec((state_dim, batch_tile), lambda i: (0, i)),   # x  [3, tb]
                pl.BlockSpec((action_dim, batch_tile), lambda i: (0, i)),  # a  [1, tb]
                pl.BlockSpec((hidden, state_dim), full),                   # W1x
                pl.BlockSpec((hidden, action_dim), full),                  # W1a
                pl.BlockSpec((hidden, 1), full),                           # b1
                pl.BlockSpec((hidden, hidden), full),                      # W2
                pl.BlockSpec((hidden, 1), full),                           # b2
                pl.BlockSpec((1, hidden), full),                           # W3
                pl.BlockSpec((1, 1), full),                                # b3
            ],
            # Lane-dense output: a [1, B] slab. The last tile may be partial;
            # its out-of-range columns are undefined in VMEM but masked on
            # writeback, so they never reach HBM (nothing reads them).
            out_specs=pl.BlockSpec((1, batch_tile), lambda i: (0, i)),
        ),
        compiler_params=pltpu.CompilerParams(
            dimension_semantics=("parallel",)),
    )(x_t, a_t, w1x, w1a, b1, w2, b2, w3, b3)

    return out_t.reshape(B, 1)


def init_params(key, state_dim, hidden_dim, action_dim):
    """Deterministic init mimicking torch.nn.Linear defaults.

    Weights in PyTorch layout [out_features, in_features]; biases [out, 1]."""
    ks = jax.random.split(key, 6)

    def lin(kw, kb, fan_in, fan_out):
        bound = float(fan_in) ** -0.5
        w = jax.random.uniform(kw, (fan_out, fan_in), jnp.float32, -bound, bound)
        b = jax.random.uniform(kb, (fan_out, 1), jnp.float32, -bound, bound)
        return w, b

    w1, b1 = lin(ks[0], ks[1], state_dim + action_dim, hidden_dim)
    w2, b2 = lin(ks[2], ks[3], hidden_dim, hidden_dim)
    w3, b3 = lin(ks[4], ks[5], hidden_dim, 1)
    return (w1, b1, w2, b2, w3, b3)


def reference_forward(x, a, params):
    w1, b1, w2, b2, w3, b3 = params
    cat = jnp.concatenate([x, a], axis=1)
    h = jnp.maximum(cat @ w1.T + b1[:, 0], 0.0)
    h = jnp.maximum(h @ w2.T + b2[:, 0], 0.0)
    return h @ w3.T + b3[:, 0]


if __name__ == "__main__":
    key = jax.random.PRNGKey(0)
    k_params, k_x, k_a = jax.random.split(key, 3)

    batch = 8   # small demo batch; the last (only) tile is a partial edge block
    params = init_params(k_params, STATE_DIM, HIDDEN_DIM, ACTION_DIM)
    x = jax.random.normal(k_x, (batch, STATE_DIM), jnp.float32)
    a = jax.random.normal(k_a, (batch, ACTION_DIM), jnp.float32)

    q_ref = reference_forward(x, a, params)

    # f32 path (default; keep f32 on v5e — its VPU has no bf16).
    prepared_f32 = prepare_params(params)            # hoisted: done once, not per call
    q = jax.block_until_ready(qvaluenet_forward(x, a, prepared_f32))
    assert q.shape == (batch, 1)
    assert jnp.allclose(q, q_ref, atol=1e-4, rtol=1e-4), "f32 mismatch vs JAX reference"

    # Optional bf16 weight/activation stream (v6e/v7x): weights are cached in
    # bf16 by prepare_params; intermediate h1/h2 are bf16 too, accumulation f32.
    prepared_bf16 = prepare_params(params, compute_dtype=jnp.bfloat16)
    q_bf16 = jax.block_until_ready(qvaluenet_forward(x, a, prepared_bf16))
    assert q_bf16.shape == (batch, 1)
    assert jnp.allclose(q_bf16, q_ref, atol=5e-2, rtol=5e-2), "bf16 mismatch vs JAX reference"

    print("KERNEL_OK")
</pallas_src>

<mosaic_0001>
module attributes {stable_mosaic.version = 11 : i64} {
  func.func @qvaluenet_kernel(%arg0: i32, %arg1: memref<3x128xf32, #tpu.memory_space<vmem>>, %arg2: memref<1x128xf32, #tpu.memory_space<vmem>>, %arg3: memref<64x3xf32, #tpu.memory_space<vmem>>, %arg4: memref<64x1xf32, #tpu.memory_space<vmem>>, %arg5: memref<64x1xf32, #tpu.memory_space<vmem>>, %arg6: memref<64x64xf32, #tpu.memory_space<vmem>>, %arg7: memref<64x1xf32, #tpu.memory_space<vmem>>, %arg8: memref<1x64xf32, #tpu.memory_space<vmem>>, %arg9: memref<1x1xf32, #tpu.memory_space<vmem>>, %arg10: memref<1x128xf32, #tpu.memory_space<vmem>>) attributes {dimension_semantics = [#tpu.dimension_semantics<parallel>], iteration_bounds = array<i64: 1>, scalar_prefetch = 0 : i64, scratch_operands = 0 : i64, tpu.core_type = #tpu.core_type<tc>, window_params = [{transform_indices = @transform_0, window_bounds = array<i64: 3, 128>}, {transform_indices = @transform_1, window_bounds = array<i64: 1, 128>}, {pipeline_mode = #tpu.pipeline_mode<synchronous>, transform_indices = @transform_2, window_bounds = array<i64: 64, 3>}, {pipeline_mode = #tpu.pipeline_mode<synchronous>, transform_indices = @transform_3, window_bounds = array<i64: 64, 1>}, {pipeline_mode = #tpu.pipeline_mode<synchronous>, transform_indices = @transform_4, window_bounds = array<i64: 64, 1>}, {pipeline_mode = #tpu.pipeline_mode<synchronous>, transform_indices = @transform_5, window_bounds = array<i64: 64, 64>}, {pipeline_mode = #tpu.pipeline_mode<synchronous>, transform_indices = @transform_6, window_bounds = array<i64: 64, 1>}, {pipeline_mode = #tpu.pipeline_mode<synchronous>, transform_indices = @transform_7, window_bounds = array<i64: 1, 64>}, {pipeline_mode = #tpu.pipeline_mode<synchronous>, transform_indices = @transform_8, window_bounds = array<i64: 1, 1>}, {transform_indices = @transform_9, window_bounds = array<i64: 1, 128>}]} {
    %c0 = arith.constant 0 : index
    %c0_0 = arith.constant 0 : index
    %0 = vector.load %arg1[%c0, %c0_0] : memref<3x128xf32, #tpu.memory_space<vmem>>, vector<3x128xf32>
    %c0_1 = arith.constant 0 : index
    %c0_2 = arith.constant 0 : index
    %1 = vector.load %arg2[%c0_1, %c0_2] : memref<1x128xf32, #tpu.memory_space<vmem>>, vector<1x128xf32>
    %c0_3 = arith.constant 0 : index
    %c0_4 = arith.constant 0 : index
    %2 = vector.load %arg3[%c0_3, %c0_4] : memref<64x3xf32, #tpu.memory_space<vmem>>, vector<64x3xf32>
    %cst = arith.constant dense<0.000000e+00> : vector<64x128xf32>
    %3 = tpu.matmul %2, %0, %cst {dimension_numbers = #tpu.dot_dimension_numbers<[1], [0], [0], [1], [0, 0, 1, 1], [], []>} : vector<64x3xf32>, vector<3x128xf32>, vector<64x128xf32> -> vector<64x128xf32>
    %c0_5 = arith.constant 0 : index
    %c0_6 = arith.constant 0 : index
    %4 = vector.load %arg4[%c0_5, %c0_6] : memref<64x1xf32, #tpu.memory_space<vmem>>, vector<64x1xf32>
    %cst_7 = arith.constant dense<0.000000e+00> : vector<64x128xf32>
    %5 = tpu.matmul %4, %1, %cst_7 {dimension_numbers = #tpu.dot_dimension_numbers<[1], [0], [0], [1], [0, 0, 1, 1], [], []>} : vector<64x1xf32>, vector<1x128xf32>, vector<64x128xf32> -> vector<64x128xf32>
    %6 = arith.addf %3, %5 : vector<64x128xf32>
    %c0_8 = arith.constant 0 : index
    %c0_9 = arith.constant 0 : index
    %7 = vector.load %arg5[%c0_8, %c0_9] : memref<64x1xf32, #tpu.memory_space<vmem>>, vector<64x1xf32>
    %8 = vector.broadcast %7 : vector<64x1xf32> to vector<64x128xf32>
    %9 = arith.addf %6, %8 : vector<64x128xf32>
    %cst_10 = arith.constant 0.000000e+00 : f32
    %10 = vector.broadcast %cst_10 : f32 to vector<64x128xf32>
    %11 = arith.maximumf %9, %10 : vector<64x128xf32>
    %c0_11 = arith.constant 0 : index
    %c0_12 = arith.constant 0 : index
    %12 = vector.load %arg6[%c0_11, %c0_12] : memref<64x64xf32, #tpu.memory_space<vmem>>, vector<64x64xf32>
    %cst_13 = arith.constant dense<0.000000e+00> : vector<64x128xf32>
    %13 = tpu.matmul %12, %11, %cst_13 {dimension_numbers = #tpu.dot_dimension_numbers<[1], [0], [0], [1], [0, 0, 1, 1], [], []>} : vector<64x64xf32>, vector<64x128xf32>, vector<64x128xf32> -> vector<64x128xf32>
    %c0_14 = arith.constant 0 : index
    %c0_15 = arith.constant 0 : index
    %14 = vector.load %arg7[%c0_14, %c0_15] : memref<64x1xf32, #tpu.memory_space<vmem>>, vector<64x1xf32>
    %15 = vector.broadcast %14 : vector<64x1xf32> to vector<64x128xf32>
    %16 = arith.addf %13, %15 : vector<64x128xf32>
    %cst_16 = arith.constant 0.000000e+00 : f32
    %17 = vector.broadcast %cst_16 : f32 to vector<64x128xf32>
    %18 = arith.maximumf %16, %17 : vector<64x128xf32>
    %c0_17 = arith.constant 0 : index
    %c0_18 = arith.constant 0 : index
    %19 = vector.load %arg8[%c0_17, %c0_18] : memref<1x64xf32, #tpu.memory_space<vmem>>, vector<1x64xf32>
    %cst_19 = arith.constant dense<0.000000e+00> : vector<1x128xf32>
    %20 = tpu.matmul %19, %18, %cst_19 {dimension_numbers = #tpu.dot_dimension_numbers<[1], [0], [0], [1], [0, 0, 1, 1], [], []>} : vector<1x64xf32>, vector<64x128xf32>, vector<1x128xf32> -> vector<1x128xf32>
    %c0_20 = arith.constant 0 : index
    %c0_21 = arith.constant 0 : index
    %21 = vector.load %arg9[%c0_20, %c0_21] : memref<1x1xf32, #tpu.memory_space<vmem>>, vector<1x1xf32>
    %22 = vector.broadcast %21 : vector<1x1xf32> to vector<1x128xf32>
    %23 = arith.addf %20, %22 : vector<1x128xf32>
    %c0_22 = arith.constant 0 : index
    %c0_23 = arith.constant 0 : index
    %24 = vector.load %arg10[%c0_22, %c0_23] : memref<1x128xf32, #tpu.memory_space<vmem>>, vector<1x128xf32>
    tpu.vector_store %arg10[%c0_22, %c0_23], %23 {strides = array<i32>} : memref<1x128xf32, #tpu.memory_space<vmem>>, vector<1x128xf32>,
    return
  }
  func.func @transform_0(%arg0: i32) -> (i32, i32) {
    %c0_i32 = arith.constant 0 : i32
    %c0_i32_0 = arith.constant 0 : i32
    return %c0_i32, %arg0 : i32, i32
  }
  func.func @transform_1(%arg0: i32) -> (i32, i32) {
    %c0_i32 = arith.constant 0 : i32
    %c0_i32_0 = arith.constant 0 : i32
    return %c0_i32, %arg0 : i32, i32
  }
  func.func @transform_2(%arg0: i32) -> (i32, i32) {
    %c0_i32 = arith.constant 0 : i32
    %c0_i32_0 = arith.constant 0 : i32
    %c0_i32_1 = arith.constant 0 : i32
    return %c0_i32, %c0_i32_0 : i32, i32
  }
  func.func @transform_3(%arg0: i32) -> (i32, i32) {
    %c0_i32 = arith.constant 0 : i32
    %c0_i32_0 = arith.constant 0 : i32
    %c0_i32_1 = arith.constant 0 : i32
    return %c0_i32, %c0_i32_0 : i32, i32
  }
  func.func @transform_4(%arg0: i32) -> (i32, i32) {
    %c0_i32 = arith.constant 0 : i32
    %c0_i32_0 = arith.constant 0 : i32
    %c0_i32_1 = arith.constant 0 : i32
    return %c0_i32, %c0_i32_0 : i32, i32
  }
  func.func @transform_5(%arg0: i32) -> (i32, i32) {
    %c0_i32 = arith.constant 0 : i32
    %c0_i32_0 = arith.constant 0 : i32
    %c0_i32_1 = arith.constant 0 : i32
    return %c0_i32, %c0_i32_0 : i32, i32
  }
  func.func @transform_6(%arg0: i32) -> (i32, i32) {
    %c0_i32 = arith.constant 0 : i32
    %c0_i32_0 = arith.constant 0 : i32
    %c0_i32_1 = arith.constant 0 : i32
    return %c0_i32, %c0_i32_0 : i32, i32
  }
  func.func @transform_7(%arg0: i32) -> (i32, i32) {
    %c0_i32 = arith.constant 0 : i32
    %c0_i32_0 = arith.constant 0 : i32
    %c0_i32_1 = arith.constant 0 : i32
    return %c0_i32, %c0_i32_0 : i32, i32
  }
  func.func @transform_8(%arg0: i32) -> (i32, i32) {
    %c0_i32 = arith.constant 0 : i32
    %c0_i32_0 = arith.constant 0 : i32
    %c0_i32_1 = arith.constant 0 : i32
    return %c0_i32, %c0_i32_0 : i32, i32
  }
  func.func @transform_9(%arg0: i32) -> (i32, i32) {
    %c0_i32 = arith.constant 0 : i32
    %c0_i32_0 = arith.constant 0 : i32
    return %c0_i32, %arg0 : i32, i32
  }
}

</mosaic_0001>

<bundles_post_ra>
// kernel: tpu_custom_call.1
= control target key start
LH: loop header
LB: loop body
LE: loop exit
PB: predicated region body
PF: predicated region fallthrough
CT: control target
= control target key end

     0   :  { %s1114_s0 = inlined_call_operand.vmem [shape: f32[3,8], index: 0, kind: input, shape index: {}]   ;;  %s1115_s1 = inlined_call_operand.vmem [shape: f32[1,8], index: 1, kind: input, shape index: {}]   ;;  %s1116_s2 = inlined_call_operand.vmem [shape: f32[64,3], index: 2, kind: input, shape index: {}]   ;;  %s1117_s3 = inlined_call_operand.vmem [shape: f32[64,1], index: 3, kind: input, shape index: {}]   ;;  %s1118_s4 = inlined_call_operand.vmem [shape: f32[64,1], index: 4, kind: input, shape index: {}]   ;;  %s1119_s5 = inlined_call_operand.vmem [shape: f32[64,64], index: 5, kind: input, shape index: {}]   ;;  %s1120_s6 = inlined_call_operand.vmem [shape: f32[64,1], index: 6, kind: input, shape index: {}]   ;;  %s1121_s7 = inlined_call_operand.vmem [shape: f32[1,64], index: 7, kind: input, shape index: {}]   ;;  %s1122_s8 = inlined_call_operand.<no memory space> [shape: f32[1,1], index: 8, kind: input, shape index: {}]   ;;  %s1123_s9 = inlined_call_operand.hbm [shape: f32[1,8], index: 9, kind: output, shape index: {}]  }
   0x1   :  { %v14_v0 = vstv %s1122_s8 }
   0x2   :  { %15 = vst [vmem:[#allocation2] sm:$0x1] %v14_v0 }
   0x3   :  { %v36_v1 = vld [vmem:[%s1115_s1] sm:$0x1]  ;;  %vm78_vm0 = vcmask 1040384   ;;  %vm53_vm1 = vcmask 7168   ;;  %v46_v3 = vld [vmem:[%s1117_s3 + $0x8] sm:$0xff]  ;;  %vm212_vm2 = vcmask 1042432  }
   0x4   :  { %v45_v2 = vld [vmem:[%s1117_s3] sm:$0xff]  ;;  %748 = vmatprep.subr.msk.mxu0 %vm78_vm0, %v36_v1  ;;  %v47_v5 = vld [vmem:[%s1117_s3 + $0x10] sm:$0xff]  ;;  %v48_v6 = vld [vmem:[%s1117_s3 + $0x18] sm:$0xff]  ;;  %v890_v8 = vmov 0  }
   0x5   :  { %750 = vmatprep.mubr.msk.f32.mxu0 %vm53_vm1, %v45_v2  ;;  %v35_v4 = vld [vmem:[%s1114_s0] sm:$0x7]  ;;  %749 = vmatpush3.msk.msra.mxu0 %vm78_vm0, %v36_v1  ;;  %v323_v10 = vld [vmem:[%s1118_s4 + $0x10] sm:$0xff]  ;;  %v50_v11 = vld [vmem:[%s1117_s3 + $0x28] sm:$0xff] }
   0x6   :  { %751 = vmatmul.mubr.msk.f32.vlgmr.msra.gmra.mrb[0].mxu0 %vm53_vm1, %v46_v3  ;;  %762 = vmatprep.subr.msk.mxu0 %vm212_vm2, %v35_v4  ;;  %v49_v7 = vld [vmem:[%s1117_s3 + $0x20] sm:$0xff]  ;;  %v322_v12 = vld [vmem:[%s1118_s4 + $0x8] sm:$0xff]  ;;  %v51_v13 = vld [vmem:[%s1117_s3 + $0x30] sm:$0xff] }
   0x7   :  { %763 = vmatpush3.msk.msra.mxu0 %vm212_vm2, %v35_v4  ;;  %753 = vmatprep.mubr.msk.f32.mxu0 %vm53_vm1, %v47_v5  ;;  %v321_v9 = vld [vmem:[%s1118_s4] sm:$0xff]  ;;  %v324_v14 = vld [vmem:[%s1118_s4 + $0x18] sm:$0xff] }
   0x8   :  { %864 = vset.pattern.permute.xlu0 %v890_v8  ;;  %865 = vset.pattern.permute.xlu1 %v890_v8 }
   0x9   :  { %331 = vperm.xlu0 %864, %v321_v9   ;;  %341 = vperm.xlu1 %865, %v323_v10  }
   0xa   :  { %754 = vmatmul.mubr.msk.f32.gmra.mrb[2].mxu0 %vm53_vm1, %v48_v6 }
   0xb   :  { %756 = vmatprep.mubr.msk.f32.mxu0 %vm53_vm1, %v49_v7 }
   0xd   :  { %336 = vperm.xlu0 %864, %v322_v12  }
   0xe   :  { %757 = vmatmul.mubr.msk.f32.gmra.mrb[4].mxu0 %vm53_vm1, %v50_v11 }
   0xf   :  { %16 = vsyncpa [#allocation4], 0  ;;  %759 = vmatprep.mubr.msk.f32.mxu0 %vm53_vm1, %v51_v13  ;;  %v52_v15 = vld [vmem:[%s1117_s3 + $0x38] sm:$0xff]  ;;  %v325_v16 = vld [vmem:[%s1118_s4 + $0x20] sm:$0xff]  ;;  %346 = vperm.xlu1 %865, %v324_v14   ;;  %vm187_vm3 = vcmask 23552   ;;  %vm441_vm4 = vcmask 523264  }
  0x10   :  { %v37_v17 = vld [vmem:[%s1116_s2] sm:$0xff]  ;;  %v326_v18 = vld [vmem:[%s1118_s4 + $0x28] sm:$0xff]  ;;  %v327_v20 = vld [vmem:[%s1118_s4 + $0x30] sm:$0xff]  ;;  %vm892_vm5 = vmmov 0   ;;  %s894_s8 = smov [#allocation3]  }
  0x11   :  { %351 = vperm.xlu0 %864, %v325_v16   ;;  %v38_v19 = vld [vmem:[%s1116_s2 + $0x8] sm:$0xff]  ;;  %v39_v21 = vld [vmem:[%s1116_s2 + $0x10] sm:$0xff]  ;;  %v328_v22 = vld [vmem:[%s1118_s4 + $0x38] sm:$0xff]  ;;  %s670_s18 = sshll.u32 %s894_s8, 4  ;;  %s671_s18 = int_to_ptr.vmem [resolvable:$true] %s670_s18 }
  0x12   :  { %760 = vmatmul.mubr.msk.f32.gmra.mrb[6].mxu0 %vm53_vm1, %v52_v15  ;;  %v40_v23 = vld [vmem:[%s1116_s2 + $0x18] sm:$0xff]  ;;  %v393_v24 = vld [vmem:[%s1120_s6] sm:$0xff]  ;;  %v394_v26 = vld [vmem:[%s1120_s6 + $0x8] sm:$0xff]  ;;  %s866_s1 = scalar_lea.vmem %s671_s18, 16  ;;  %s870_s3 = scalar_lea.vmem %s671_s18, 32 }
  0x13   :  { %764 = vmatprep.mubr.msk.f32.mxu0 %vm187_vm3, %v37_v17  ;;  %356 = vperm.xlu1 %865, %v326_v18   ;;  %v41_v25 = vld [vmem:[%s1116_s2 + $0x20] sm:$0xff]  ;;  %v42_v27 = vld [vmem:[%s1116_s2 + $0x28] sm:$0xff]  ;;  %v395_v28 = vld [vmem:[%s1120_s6 + $0x10] sm:$0xff]  ;;  %v891_v17 = vmov 0.0|0.0   ;;  %v893_v18 = vmov 0.0   ;;  %p867_p0 = scmp.ne.s32.totalorder %s671_s18, %s866_s1  ;;  %p871_p1 = scmp.lt.s32.totalorder %s671_s18, %s671_s18 }
  0x14   :  { %v43_v29 = vld [vmem:[%s1116_s2 + $0x30] sm:$0xff]  ;;  %v396_v30 = vld [vmem:[%s1120_s6 + $0x18] sm:$0xff]  ;;  %v397_v32 = vld [vmem:[%s1120_s6 + $0x20] sm:$0xff]  ;;  %p872_p2 = scmp.lt.s32.totalorder %s870_s3, %s866_s1 }
  0x15   :  { %361 = vperm.xlu0 %864, %v327_v20   ;;  %v44_v31 = vld [vmem:[%s1116_s2 + $0x38] sm:$0xff]  ;;  %v398_v33 = vld [vmem:[%s1120_s6 + $0x28] sm:$0xff]  ;;  %v399_v34 = vld [vmem:[%s1120_s6 + $0x30] sm:$0xff] }
  0x16   :  { %765 = vmatmul.mubr.msk.f32.vlgmr.msra.gmra.mrb[0].mxu0 %vm187_vm3, %v38_v19  ;;  %v400_v35 = vld [vmem:[%s1120_s6 + $0x38] sm:$0xff]  ;;  %v580_v36 = vld [vmem:[#allocation2] sm:$0x1]  ;;  %v386_v10 = vld [vmem:[%s1119_s5 + $0x8] sm:$0xff]  ;;  %p873_p3 = por %p872_p2, %p871_p1 }
  0x17   :  { %767 = vmatprep.mubr.msk.f32.mxu0 %vm187_vm3, %v39_v21  ;;  %366 = vperm.xlu1 %865, %v328_v22   ;;  %v385_v37 = vld [vmem:[%s1119_s5] sm:$0xff]  ;;  %v387_v11 = vld [vmem:[%s1119_s5 + $0x10] sm:$0xff]  ;;  %v388_v12 = vld [vmem:[%s1119_s5 + $0x18] sm:$0xff] }
  0x18   :  { %792 = vmatprep.mubr.msk.f32.mxu1 %vm441_vm4, %v385_v37  ;;  %v389_v13 = vld [vmem:[%s1119_s5 + $0x20] sm:$0xff]  ;;  %v390_v14 = vld [vmem:[%s1119_s5 + $0x28] sm:$0xff]  ;;  %v391_v15 = vld [vmem:[%s1119_s5 + $0x30] sm:$0xff]  ;;  %p874_p4 = pnand %p873_p3, %p867_p0 }
  0x19   :  { %403 = vperm.xlu0 %864, %v393_v24   ;;  %v392_v16 = vld [vmem:[%s1119_s5 + $0x38] sm:$0xff] }
  0x1a   :  { %768 = vmatmul.mubr.msk.f32.gmra.mrb[2].mxu0 %vm187_vm3, %v40_v23 }
  0x1b   :  { %770 = vmatprep.mubr.msk.f32.mxu0 %vm187_vm3, %v41_v25  ;;  %408 = vperm.xlu1 %865, %v394_v26  }
  0x1d   :  { %413 = vperm.xlu0 %864, %v395_v28  }
  0x1e   :  { %771 = vmatmul.mubr.msk.f32.gmra.mrb[4].mxu0 %vm187_vm3, %v42_v27 }
  0x1f   :  { %773 = vmatprep.mubr.msk.f32.mxu0 %vm187_vm3, %v43_v29  ;;  %418 = vperm.xlu1 %865, %v396_v30  }
  0x21   :  { %423 = vperm.xlu0 %864, %v397_v32  }
  0x22   :  { %774 = vmatmul.mubr.msk.f32.gmra.mrb[6].mxu0 %vm187_vm3, %v44_v31 }
  0x23   :  { %428 = vperm.xlu1 %865, %v398_v33  }
  0x25   :  { %433 = vperm.xlu0 %864, %v399_v34  }
  0x27   :  { %438 = vperm.xlu1 %865, %v400_v35  }
  0x29   :  { %583 = vperm.xlu0 %864, %v580_v36  }
  0x88   :  { %v332_v38 = vpop.permute.xlu0 %331  ;;  %v342_v39 = vpop.permute.xlu1 %341 }
  0x8c   :  { %v337_v40 = vpop.permute.xlu0 %336 }
  0x8e   :  { %v347_v41 = vpop.permute.xlu1 %346 }
  0x90   :  { %v352_v54 = vpop.permute.xlu0 %351 }
  0x92   :  { %v357_v51 = vpop.permute.xlu1 %356 }
  0x94   :  { %v362_v2 = vpop.permute.xlu0 %361 }
  0x96   :  { %v367_v63 = vpop.permute.xlu1 %366 }
  0x98   :  { %v404_v20 = vpop.permute.xlu0 %403 }
  0x9a   :  { %v409_v19 = vpop.permute.xlu1 %408 }
  0x9c   :  { %v414_v23 = vpop.permute.xlu0 %413 }
  0x9e   :  { %v419_v21 = vpop.permute.xlu1 %418 }
  0xa0   :  { %v424_v35 = vpop.permute.xlu0 %423 }
  0xa2   :  { %v429_v32 = vpop.permute.xlu1 %428 }
  0xe9   :  { %v766_v42 = vpop.f32.mrb[0].mxu0 }
  0xea   :  { %v370_v43 = vadd.f32 %v766_v42, %v337_v40  ;;  %v282_v44 = vpop.f32.mrb[1].mxu0 }
  0xeb   :  { %v369_v45 = vadd.f32 %v332_v38, %v282_v44  ;;  %v439_v44 = vpop.permute.xlu1 %438 }
  0xec   :  { %v378_v46 = vmax.f32 %v370_v43, 0.0 }
  0xed   :  { %v377_v47 = vmax.f32 %v369_v45, 0.0  ;;  %v769_v48 = vpop.f32.mrb[2].mxu0 }
  0xee   :  { %v372_v49 = vadd.f32 %v769_v48, %v347_v41  ;;  %v292_v50 = vpop.f32.mrb[3].mxu0 }
  0xef   :  { %v371_v52 = vadd.f32 %v342_v39, %v292_v50  ;;  %v823_v53 = vpack.c.bf16 %v378_v46, %v377_v47  ;;  %v434_v47 = vpop.permute.xlu0 %433 }
  0xf0   :  { %v380_v55 = vmax.f32 %v372_v49, 0.0 }
  0xf1   :  { %v379_v56 = vmax.f32 %v371_v52, 0.0  ;;  %v772_v57 = vpop.f32.mrb[4].mxu0  ;;  %824 = vmatprep.subr.bf16.mxu1 %v823_v53 }
  0xf2   :  { %v374_v58 = vadd.f32 %v772_v57, %v357_v51  ;;  %v302_v59 = vpop.f32.mrb[5].mxu0  ;;  %826 = vmatpush3.bf16.msra.mxu1 %v823_v53 }
  0xf3   :  { %v827_v60 = vpack.c.bf16 %v380_v55, %v379_v56  ;;  %v373_v61 = vadd.f32 %v352_v54, %v302_v59  ;;  %v579_v55 = vld [vmem:[%s1121_s7] sm:$0x1]  ;;  %v586_v56 = vlaneseq  ;;  %v584_v59 = vpop.permute.xlu0 %583 }
  0xf4   :  { %v382_v62 = vmax.f32 %v374_v58, 0.0 }
  0xf5   :  { %v381_v0 = vmax.f32 %v373_v61, 0.0  ;;  %v775_v1 = vpop.f32.mrb[6].mxu0  ;;  %828 = vmatprep.subr.bf16.mxu1 %v827_v60  ;;  %v587_v57 = vshrl.u32 %v586_v56, 7 }
  0xf6   :  { %v376_v3 = vadd.f32 %v775_v1, %v367_v63  ;;  %v312_v4 = vpop.f32.mrb[7].mxu0  ;;  %830 = vmatpush3.bf16.msra.mxu1 %v827_v60 }
  0xf7   :  { %v831_v5 = vpack.c.bf16 %v382_v62, %v381_v0  ;;  %v375_v6 = vadd.f32 %v362_v2, %v312_v4  ;;  %v588_v58 = vsub.s32 0, %v587_v57 }
  0xf8   :  { %v384_v7 = vmax.f32 %v376_v3, 0.0 }
  0xf9   :  { %v383_v8 = vmax.f32 %v375_v6, 0.0  ;;  %832 = vmatprep.subr.bf16.mxu1 %v831_v5  ;;  %v589_v60 = vrot.slane %v584_v59, %v588_v58 }
  0xfa   :  { %834 = vmatpush3.bf16.msra.mxu1 %v831_v5 }
  0xfb   :  { %v835_v9 = vpack.c.bf16 %v384_v7, %v383_v8 }
  0xfd   :  { %836 = vmatprep.subr.bf16.mxu1 %v835_v9 }
  0xfe   :  { %838 = vmatpush3.bf16.msra.mxu1 %v835_v9 }
  0xff   :  { %839 = vmatprep.subr.bf16.mxu1 %v891_v17 }
 0x101   :  { %793 = vmatmul.mubr.msk.f32.vlgmr.msra.gmra.mrb[0].mxu1 %vm441_vm4, %v386_v10 }
 0x102   :  { %795 = vmatprep.mubr.msk.f32.mxu1 %vm441_vm4, %v387_v11 }
 0x105   :  { %796 = vmatmul.mubr.msk.f32.gmra.mrb[2].mxu1 %vm441_vm4, %v388_v12 }
 0x106   :  { %798 = vmatprep.mubr.msk.f32.mxu1 %vm441_vm4, %v389_v13 }
 0x109   :  { %799 = vmatmul.mubr.msk.f32.gmra.mrb[4].mxu1 %vm441_vm4, %v390_v14 }
 0x10a   :  { %801 = vmatprep.mubr.msk.f32.mxu1 %vm441_vm4, %v391_v15 }
 0x10d   :  { %802 = vmatmul.mubr.msk.f32.gmra.mrb[6].mxu1 %vm441_vm4, %v392_v16 }
 0x10e   :  { %820 = vmatprep.mubr.msk.f32.mxu1 %vm892_vm5, %v893_v18 }
 0x1d4   :  { %v794_v22 = vpop.f32.mrb[0].mxu1 }
 0x1d5   :  { %v538_v24 = vadd.f32 %v794_v22, %v409_v19  ;;  %v532_v25 = vpop.f32.mrb[1].mxu1 }
 0x1d6   :  { %v533_v26 = vadd.f32 %v532_v25, %v404_v20 }
 0x1d7   :  { %v572_v27 = vmax.f32 %v538_v24, 0.0 }
 0x1d8   :  { %v571_v28 = vmax.f32 %v533_v26, 0.0  ;;  %v797_v29 = vpop.f32.mrb[2].mxu1 }
 0x1d9   :  { %v548_v30 = vadd.f32 %v797_v29, %v419_v21  ;;  %v542_v31 = vpop.f32.mrb[3].mxu1 }
 0x1da   :  { %v840_v33 = vpack.c.bf16 %v572_v27, %v571_v28  ;;  %v543_v34 = vadd.f32 %v542_v31, %v414_v23 }
 0x1db   :  { %v574_v36 = vmax.f32 %v548_v30, 0.0 }
 0x1dc   :  { %v573_v37 = vmax.f32 %v543_v34, 0.0  ;;  %v800_v38 = vpop.f32.mrb[4].mxu1  ;;  %841 = vmatpush3.bf16.msra.mxu1 %v840_v33 }
 0x1dd   :  { %v558_v39 = vadd.f32 %v800_v38, %v429_v32  ;;  %v552_v40 = vpop.f32.mrb[5].mxu1  ;;  %842 = vmatprep.subr.bf16.mxu1 %v891_v17 }
 0x1de   :  { %v843_v41 = vpack.c.bf16 %v574_v36, %v573_v37  ;;  %v553_v42 = vadd.f32 %v552_v40, %v424_v35 }
 0x1df   :  { %v576_v43 = vmax.f32 %v558_v39, 0.0 }
 0x1e0   :  { %v575_v45 = vmax.f32 %v553_v42, 0.0  ;;  %v803_v46 = vpop.f32.mrb[6].mxu1  ;;  %844 = vmatpush3.bf16.msra.mxu1 %v843_v41 }
 0x1e1   :  { %v568_v48 = vadd.f32 %v803_v46, %v439_v44  ;;  %v562_v49 = vpop.f32.mrb[7].mxu1  ;;  %845 = vmatprep.subr.bf16.mxu1 %v891_v17 }
 0x1e2   :  { %v846_v50 = vpack.c.bf16 %v576_v43, %v575_v45  ;;  %v563_v51 = vadd.f32 %v562_v49, %v434_v47 }
 0x1e3   :  { %v578_v52 = vmax.f32 %v568_v48, 0.0 }
 0x1e4   :  { %v577_v53 = vmax.f32 %v563_v51, 0.0  ;;  %847 = vmatpush3.bf16.msra.mxu1 %v846_v50 }
 0x1e5   :  { %848 = vmatprep.subr.bf16.mxu1 %v891_v17 }
 0x1e6   :  { %v849_v54 = vpack.c.bf16 %v578_v52, %v577_v53 }
 0x1e8   :  { %850 = vmatpush3.bf16.msra.mxu1 %v849_v54 }
 0x1eb   :  { %821 = vmatmul.mubr.msk.f32.vlgmr.msra.gmra.mrb[8].mxu1 %vm441_vm4, %v579_v55 }
 0x2be   :  { %v659_v61 = vpop.f32.mrb[8].mxu1 }
 0x2bf   :  { %v660_v62 = vadd.f32 %v659_v61, %v589_v60  ;;  %v822_v63 = vpop.f32.mrb[9].mxu1 }
 0x2c1   :  { %663 = vst [vmem:[#allocation3] sm:$0x1] %v660_v62 }
 0x2c2   :  { %877 = shalt.err (!%p874_p4)
}
 0x2c3   :  { %s878_s20 = scalar_lea.hbm %s1123_s9, 16 }
 0x2c4   :  { %p879_p5 = scmp.ne.s32.totalorder %s1123_s9, %s878_s20  ;;  %p882_p6 = scmp.lt.u32.totalorder %s878_s20, %s1123_s9 }
 0x2c6   :  { %p884_p7 = pnand %p882_p6, %p879_p5 }
 0x2c8   :  { %887 = shalt.err (!%p884_p7)
}
 0x2c9   :  { %673 = dma.vmem_to_hbm [thread:$0]  %s671_s18, 16, %s1123_s9, [#allocation4]  }
 0x2ca   :  { %888 = dma.done.wait [#allocation4], 16  }
 0x2cb   :  { %889 = vsyncadd [#allocation4], 4294967280 }
 0x2cc   :  { %677 = vsyncpa [#allocation4], 1 }

</bundles_post_ra>
